<compile_context>
chip_gen: v7x
topology: tpu7x:2x2x1
jax: 0.10.0
libtpu: 0.0.40
codegen_flags: <defaults>
</compile_context>

<pallas_src>
import functools

import jax
import jax.numpy as jnp
from jax import lax
from jax.experimental import pallas as pl
from jax.experimental.pallas import tpu as pltpu

BN_EPS = 1e-5
FUSED_MAX_ROWS = 4096      # single-call VMEM-resident path up to this many rows
DEFAULT_ROW_TILE = 2048    # rows per grid step for the batch-tiled path


def _round_up(n, m):
    return ((n + m - 1) // m) * m


def _bn_scale_shift(sum_row, sumsq_row, gamma, beta, inv_b):
    """Reassociated training-mode BatchNorm factors on the [1, F] row.

    Full-width [B, F] work becomes a single h*scale + shift.
    """
    mean = sum_row * inv_b
    var = sumsq_row * inv_b - mean * mean          # E[h^2] - mean^2 (f32)
    scale = gamma * lax.rsqrt(var + BN_EPS)
    shift = beta - mean * scale
    return scale, shift


# ---------------------------------------------------------------------------
# Small-batch path: one fused, fully VMEM-resident kernel.
# ---------------------------------------------------------------------------
def _fused_kernel(x_ref, w1_ref, g1_ref, be1_ref, w2_ref, g2_ref, be2_ref,
                  w3_ref, b3_ref, out_ref, *, inv_b):
    x = x_ref[...].astype(jnp.bfloat16)            # cast fused in-kernel
    h1 = jnp.dot(x, w1_ref[...], preferred_element_type=jnp.float32)
    sc1, sh1 = _bn_scale_shift(jnp.sum(h1, 0, keepdims=True),
                               jnp.sum(h1 * h1, 0, keepdims=True),
                               g1_ref[...], be1_ref[...], inv_b)
    h1 = jnp.maximum(h1 * sc1 + sh1, 0.0)

    h2 = jnp.dot(h1.astype(jnp.bfloat16), w2_ref[...],
                 preferred_element_type=jnp.float32)
    sc2, sh2 = _bn_scale_shift(jnp.sum(h2, 0, keepdims=True),
                               jnp.sum(h2 * h2, 0, keepdims=True),
                               g2_ref[...], be2_ref[...], inv_b)
    h2 = jnp.maximum(h2 * sc2 + sh2, 0.0)

    logits = jnp.dot(h2.astype(jnp.bfloat16), w3_ref[...],
                     preferred_element_type=jnp.float32) + b3_ref[...]
    s = 0.5 * (jnp.tanh(0.5 * logits) + 1.0)       # sigmoid via one EUP tanh
    e = jnp.exp(s)                                 # s in (0,1): no max-subtract needed
    out_ref[...] = (e / jnp.sum(e, axis=1, keepdims=True)).astype(out_ref.dtype)


def _forward_fused(x, params):
    B = x.shape[0]
    out_size = params["w3"].shape[1]
    vmem = pl.BlockSpec(memory_space=pltpu.MemorySpace.VMEM)
    args = (x,
            params["w1"], params["g1"], params["be1"],
            params["w2"], params["g2"], params["be2"],
            params["w3"], params["b3"])
    return pl.pallas_call(
        functools.partial(_fused_kernel, inv_b=1.0 / B),
        out_shape=jax.ShapeDtypeStruct((B, out_size), jnp.float32),
        in_specs=[vmem] * len(args),
        out_specs=vmem,
    )(*args)


# ---------------------------------------------------------------------------
# Large-batch path: row-tiled grid, three passes (full-batch-exact BN stats).
# Activations are recomputed instead of written to HBM (compute is cheap vs BW).
# ---------------------------------------------------------------------------
def _stats1_kernel(x_ref, w1_ref, p1_ref):
    # Zero-padded rows give h1 == 0 exactly (no bias, zero x) -> no mask needed.
    x = x_ref[...].astype(jnp.bfloat16)
    h1 = jnp.dot(x, w1_ref[...], preferred_element_type=jnp.float32)
    p1_ref[0] = jnp.concatenate(
        [jnp.sum(h1, 0, keepdims=True), jnp.sum(h1 * h1, 0, keepdims=True)], axis=0)


def _stats2_kernel(x_ref, s1_ref, g1_ref, be1_ref, w1_ref, w2_ref, p2_ref,
                   *, inv_b, true_b, tile_b):
    i = pl.program_id(0)
    x = x_ref[...].astype(jnp.bfloat16)
    h1 = jnp.dot(x, w1_ref[...], preferred_element_type=jnp.float32)
    sc1, sh1 = _bn_scale_shift(s1_ref[0:1, :], s1_ref[1:2, :],
                               g1_ref[...], be1_ref[...], inv_b)
    h1 = jnp.maximum(h1 * sc1 + sh1, 0.0)
    h2 = jnp.dot(h1.astype(jnp.bfloat16), w2_ref[...],
                 preferred_element_type=jnp.float32)
    # Padded rows produce nonzero h2 (shift != 0): mask them out of the stats.
    row = i * tile_b + lax.broadcasted_iota(jnp.int32, (tile_b, 1), 0)
    h2v = jnp.where(row < true_b, h2, 0.0)
    p2_ref[0] = jnp.concatenate(
        [jnp.sum(h2v, 0, keepdims=True), jnp.sum(h2v * h2v, 0, keepdims=True)], axis=0)


def _output_kernel(x_ref, s1_ref, g1_ref, be1_ref, s2_ref, g2_ref, be2_ref,
                   w1_ref, w2_ref, w3_ref, b3_ref, out_ref, *, inv_b):
    x = x_ref[...].astype(jnp.bfloat16)
    h1 = jnp.dot(x, w1_ref[...], preferred_element_type=jnp.float32)
    sc1, sh1 = _bn_scale_shift(s1_ref[0:1, :], s1_ref[1:2, :],
                               g1_ref[...], be1_ref[...], inv_b)
    h1 = jnp.maximum(h1 * sc1 + sh1, 0.0)

    h2 = jnp.dot(h1.astype(jnp.bfloat16), w2_ref[...],
                 preferred_element_type=jnp.float32)
    sc2, sh2 = _bn_scale_shift(s2_ref[0:1, :], s2_ref[1:2, :],
                               g2_ref[...], be2_ref[...], inv_b)
    h2 = jnp.maximum(h2 * sc2 + sh2, 0.0)

    logits = jnp.dot(h2.astype(jnp.bfloat16), w3_ref[...],
                     preferred_element_type=jnp.float32) + b3_ref[...]
    s = 0.5 * (jnp.tanh(0.5 * logits) + 1.0)
    e = jnp.exp(s)
    out_ref[...] = (e / jnp.sum(e, axis=1, keepdims=True)).astype(out_ref.dtype)


def _resident(shape):
    """Full-array, constant-index BlockSpec (block stays VMEM-resident over grid)."""
    ndim = len(shape)
    return pl.BlockSpec(shape, lambda i, _n=ndim: (0,) * _n)


def _forward_tiled(x, params, row_tile):
    B, in_size = x.shape
    F1 = params["w1"].shape[1]
    F3 = params["w2"].shape[1]
    out_size = params["w3"].shape[1]

    tb = min(row_tile, _round_up(B, 8))            # tile rows (multiple of 8)
    Bp = _round_up(B, tb)
    nt = Bp // tb
    if Bp != B:
        x = jnp.pad(x, ((0, Bp - B), (0, 0)))      # zero-pad: exact for stats pass 1
    inv_b = 1.0 / B

    x_spec = pl.BlockSpec((tb, in_size), lambda i: (i, 0))
    parallel = pltpu.CompilerParams(dimension_semantics=("parallel",))

    # Pass 1: per-tile partial sum/sumsq of h1 (reduced outside -> full-batch stats).
    p1 = pl.pallas_call(
        _stats1_kernel,
        out_shape=jax.ShapeDtypeStruct((nt, 2, F1), jnp.float32),
        grid=(nt,),
        in_specs=[x_spec, _resident((in_size, F1))],
        out_specs=pl.BlockSpec((1, 2, F1), lambda i: (i, 0, 0)),
        compiler_params=parallel,
    )(x, params["w1"])
    s1 = jnp.sum(p1, axis=0)

    # Pass 2: BN1 + ReLU + Linear2, per-tile partial sum/sumsq of h2.
    p2 = pl.pallas_call(
        functools.partial(_stats2_kernel, inv_b=inv_b, true_b=B, tile_b=tb),
        out_shape=jax.ShapeDtypeStruct((nt, 2, F3), jnp.float32),
        grid=(nt,),
        in_specs=[x_spec,
                  _resident((2, F1)), _resident((1, F1)), _resident((1, F1)),
                  _resident((in_size, F1)), _resident((F1, F3))],
        out_specs=pl.BlockSpec((1, 2, F3), lambda i: (i, 0, 0)),
        compiler_params=parallel,
    )(x, s1, params["g1"], params["be1"], params["w1"], params["w2"])
    s2 = jnp.sum(p2, axis=0)

    # Pass 3: full forward with precomputed stats, tiled output.
    out_p = pl.pallas_call(
        functools.partial(_output_kernel, inv_b=inv_b),
        out_shape=jax.ShapeDtypeStruct((Bp, out_size), jnp.float32),
        grid=(nt,),
        in_specs=[x_spec,
                  _resident((2, F1)), _resident((1, F1)), _resident((1, F1)),
                  _resident((2, F3)), _resident((1, F3)), _resident((1, F3)),
                  _resident((in_size, F1)), _resident((F1, F3)),
                  _resident((F3, out_size)), _resident((1, out_size))],
        out_specs=pl.BlockSpec((tb, out_size), lambda i: (i, 0)),
        compiler_params=parallel,
    )(x, s1, params["g1"], params["be1"], s2, params["g2"], params["be2"],
      params["w1"], params["w2"], params["w3"], params["b3"])

    return out_p[:B] if Bp != B else out_p


# ---------------------------------------------------------------------------
# Public API
# ---------------------------------------------------------------------------
def prepare_params(params):
    """One-time kernel-side prep: pre-cast Linear weights to bf16 (no per-call
    .astype HLO ops, half the weight DMA bytes) and drop b1/b2 (exactly cancelled
    by training-mode BN mean subtraction)."""
    p = dict(params)
    for k in ("w1", "w2", "w3"):
        p[k] = params[k].astype(jnp.bfloat16)
    p.pop("b1", None)
    p.pop("b2", None)
    return p


def model_forward(x, params, *, row_tile=DEFAULT_ROW_TILE, force_tiled=False):
    """x: [B, input_size] float32.  params: output of prepare_params(init_params(...))."""
    if not force_tiled and x.shape[0] <= FUSED_MAX_ROWS:
        return _forward_fused(x, params)
    return _forward_tiled(x, params, row_tile)


def reference_forward(x, params):
    """Pure-JAX f32 reference matching the PyTorch Model forward (training-mode BN)."""
    def bn(h, g, b):
        m = jnp.mean(h, axis=0, keepdims=True)
        v = jnp.mean((h - m) ** 2, axis=0, keepdims=True)
        return (h - m) / jnp.sqrt(v + BN_EPS) * g + b

    h1 = jnp.maximum(bn(x @ params["w1"] + params["b1"],
                        params["g1"], params["be1"]), 0.0)
    h2 = jnp.maximum(bn(h1 @ params["w2"] + params["b2"],
                        params["g2"], params["be2"]), 0.0)
    logits = h2 @ params["w3"] + params["b3"]
    s = jax.nn.sigmoid(logits)
    return jax.nn.softmax(s, axis=1)


def init_params(key, input_size, hidden_size, output_size):
    """Deterministic synthetic parameters matching Model.__init__ shapes (f32).

    Linear weights are stored [in, out] (transposed vs PyTorch's [out, in]).
    Biases / BN params are [1, F] rows so they broadcast on lanes.
    """
    h5 = hidden_size * 5
    h3 = hidden_size * 3
    ks = jax.random.split(key, 6)

    def lin(kw, kb, fan_in, fan_out):
        bound = 1.0 / jnp.sqrt(fan_in)
        w = jax.random.uniform(kw, (fan_in, fan_out), jnp.float32, -bound, bound)
        b = jax.random.uniform(kb, (1, fan_out), jnp.float32, -bound, bound)
        return w, b

    w1, b1 = lin(ks[0], ks[1], input_size, h5)
    w2, b2 = lin(ks[2], ks[3], h5, h3)
    w3, b3 = lin(ks[4], ks[5], h3, output_size)

    return {
        "w1": w1, "b1": b1,
        "g1": jnp.ones((1, h5), jnp.float32), "be1": jnp.zeros((1, h5), jnp.float32),
        "w2": w2, "b2": b2,
        "g2": jnp.ones((1, h3), jnp.float32), "be2": jnp.zeros((1, h3), jnp.float32),
        "w3": w3, "b3": b3,
    }


if __name__ == "__main__":
    key = jax.random.PRNGKey(0)
    k_x, k_p = jax.random.split(key)

    batch = 8
    input_size = 32
    hidden_size = 32
    output_size = 4

    params_f32 = init_params(k_p, input_size, hidden_size, output_size)
    params = prepare_params(params_f32)

    # --- fused small-batch path ---
    x = jax.random.normal(k_x, (batch, input_size), jnp.float32)
    out = jax.block_until_ready(model_forward(x, params))
    assert out.shape == (batch, output_size)
    assert jnp.allclose(jnp.sum(out, axis=1), 1.0, atol=1e-3)
    ref = reference_forward(x, params_f32)
    assert jnp.allclose(out, ref, atol=2e-2), float(jnp.max(jnp.abs(out - ref)))

    # --- batch-tiled path exercised at small scale (B=20, tile=8 -> 3 tiles,
    #     last tile zero-padded; covers full-batch BN stats + row masking) ---
    x2 = jax.random.normal(jax.random.PRNGKey(1), (20, input_size), jnp.float32)
    out2 = jax.block_until_ready(
        model_forward(x2, params, force_tiled=True, row_tile=8))
    assert out2.shape == (20, output_size)
    assert jnp.allclose(jnp.sum(out2, axis=1), 1.0, atol=1e-3)
    ref2 = reference_forward(x2, params_f32)
    assert jnp.allclose(out2, ref2, atol=2e-2), float(jnp.max(jnp.abs(out2 - ref2)))

    print("KERNEL_OK")
</pallas_src>

<mosaic_0001>
module attributes {stable_mosaic.version = 11 : i64} {
  func.func @_fused_kernel(%arg0: memref<8x32xf32, #tpu.memory_space<vmem>>, %arg1: memref<32x160xbf16, #tpu.memory_space<vmem>>, %arg2: memref<1x160xf32, #tpu.memory_space<vmem>>, %arg3: memref<1x160xf32, #tpu.memory_space<vmem>>, %arg4: memref<160x96xbf16, #tpu.memory_space<vmem>>, %arg5: memref<1x96xf32, #tpu.memory_space<vmem>>, %arg6: memref<1x96xf32, #tpu.memory_space<vmem>>, %arg7: memref<96x4xbf16, #tpu.memory_space<vmem>>, %arg8: memref<1x4xf32, #tpu.memory_space<vmem>>, %arg9: memref<8x4xf32, #tpu.memory_space<vmem>>) attributes {dimension_semantics = [], scalar_prefetch = 0 : i64, scratch_operands = 0 : i64, tpu.core_type = #tpu.core_type<tc>} {
    %c0 = arith.constant 0 : index
    %c0_0 = arith.constant 0 : index
    %0 = vector.load %arg0[%c0, %c0_0] : memref<8x32xf32, #tpu.memory_space<vmem>>, vector<8x32xf32>
    %1 = arith.truncf %0 : vector<8x32xf32> to vector<8x32xbf16>
    %c0_1 = arith.constant 0 : index
    %c0_2 = arith.constant 0 : index
    %2 = vector.load %arg1[%c0_1, %c0_2] : memref<32x160xbf16, #tpu.memory_space<vmem>>, vector<32x160xbf16>
    %cst = arith.constant dense<0.000000e+00> : vector<8x160xf32>
    %3 = tpu.matmul %1, %2, %cst {dimension_numbers = #tpu.dot_dimension_numbers<[1], [0], [0], [1], [0, 0, 1, 1], [], []>} : vector<8x32xbf16>, vector<32x160xbf16>, vector<8x160xf32> -> vector<8x160xf32>
    %cst_3 = arith.constant dense<0.000000e+00> : vector<160xf32>
    %4 = vector.multi_reduction <add>, %3, %cst_3 [0] : vector<8x160xf32> to vector<160xf32>
    %5 = vector.shape_cast %4 : vector<160xf32> to vector<1x160xf32>
    %6 = arith.mulf %3, %3 : vector<8x160xf32>
    %cst_4 = arith.constant dense<0.000000e+00> : vector<160xf32>
    %7 = vector.multi_reduction <add>, %6, %cst_4 [0] : vector<8x160xf32> to vector<160xf32>
    %8 = vector.shape_cast %7 : vector<160xf32> to vector<1x160xf32>
    %c0_5 = arith.constant 0 : index
    %c0_6 = arith.constant 0 : index
    %9 = vector.load %arg2[%c0_5, %c0_6] : memref<1x160xf32, #tpu.memory_space<vmem>>, vector<1x160xf32>
    %c0_7 = arith.constant 0 : index
    %c0_8 = arith.constant 0 : index
    %10 = vector.load %arg3[%c0_7, %c0_8] : memref<1x160xf32, #tpu.memory_space<vmem>>, vector<1x160xf32>
    %cst_9 = arith.constant 1.250000e-01 : f32
    %11 = vector.broadcast %cst_9 : f32 to vector<1x160xf32>
    %12 = arith.mulf %5, %11 : vector<1x160xf32>
    %cst_10 = arith.constant 1.250000e-01 : f32
    %13 = vector.broadcast %cst_10 : f32 to vector<1x160xf32>
    %14 = arith.mulf %8, %13 : vector<1x160xf32>
    %15 = arith.mulf %12, %12 : vector<1x160xf32>
    %16 = arith.subf %14, %15 : vector<1x160xf32>
    %cst_11 = arith.constant 9.99999974E-6 : f32
    %17 = vector.broadcast %cst_11 : f32 to vector<1x160xf32>
    %18 = arith.addf %16, %17 : vector<1x160xf32>
    %19 = math.rsqrt %18 : vector<1x160xf32>
    %20 = arith.mulf %9, %19 : vector<1x160xf32>
    %21 = arith.mulf %12, %20 : vector<1x160xf32>
    %22 = arith.subf %10, %21 : vector<1x160xf32>
    %23 = vector.broadcast %20 : vector<1x160xf32> to vector<8x160xf32>
    %24 = arith.mulf %3, %23 : vector<8x160xf32>
    %25 = vector.broadcast %22 : vector<1x160xf32> to vector<8x160xf32>
    %26 = arith.addf %24, %25 : vector<8x160xf32>
    %cst_12 = arith.constant 0.000000e+00 : f32
    %27 = vector.broadcast %cst_12 : f32 to vector<8x160xf32>
    %28 = arith.maximumf %26, %27 : vector<8x160xf32>
    %29 = arith.truncf %28 : vector<8x160xf32> to vector<8x160xbf16>
    %c0_13 = arith.constant 0 : index
    %c0_14 = arith.constant 0 : index
    %30 = vector.load %arg4[%c0_13, %c0_14] : memref<160x96xbf16, #tpu.memory_space<vmem>>, vector<160x96xbf16>
    %cst_15 = arith.constant dense<0.000000e+00> : vector<8x96xf32>
    %31 = tpu.matmul %29, %30, %cst_15 {dimension_numbers = #tpu.dot_dimension_numbers<[1], [0], [0], [1], [0, 0, 1, 1], [], []>} : vector<8x160xbf16>, vector<160x96xbf16>, vector<8x96xf32> -> vector<8x96xf32>
    %cst_16 = arith.constant dense<0.000000e+00> : vector<96xf32>
    %32 = vector.multi_reduction <add>, %31, %cst_16 [0] : vector<8x96xf32> to vector<96xf32>
    %33 = vector.shape_cast %32 : vector<96xf32> to vector<1x96xf32>
    %34 = arith.mulf %31, %31 : vector<8x96xf32>
    %cst_17 = arith.constant dense<0.000000e+00> : vector<96xf32>
    %35 = vector.multi_reduction <add>, %34, %cst_17 [0] : vector<8x96xf32> to vector<96xf32>
    %36 = vector.shape_cast %35 : vector<96xf32> to vector<1x96xf32>
    %c0_18 = arith.constant 0 : index
    %c0_19 = arith.constant 0 : index
    %37 = vector.load %arg5[%c0_18, %c0_19] : memref<1x96xf32, #tpu.memory_space<vmem>>, vector<1x96xf32>
    %c0_20 = arith.constant 0 : index
    %c0_21 = arith.constant 0 : index
    %38 = vector.load %arg6[%c0_20, %c0_21] : memref<1x96xf32, #tpu.memory_space<vmem>>, vector<1x96xf32>
    %cst_22 = arith.constant 1.250000e-01 : f32
    %39 = vector.broadcast %cst_22 : f32 to vector<1x96xf32>
    %40 = arith.mulf %33, %39 : vector<1x96xf32>
    %cst_23 = arith.constant 1.250000e-01 : f32
    %41 = vector.broadcast %cst_23 : f32 to vector<1x96xf32>
    %42 = arith.mulf %36, %41 : vector<1x96xf32>
    %43 = arith.mulf %40, %40 : vector<1x96xf32>
    %44 = arith.subf %42, %43 : vector<1x96xf32>
    %cst_24 = arith.constant 9.99999974E-6 : f32
    %45 = vector.broadcast %cst_24 : f32 to vector<1x96xf32>
    %46 = arith.addf %44, %45 : vector<1x96xf32>
    %47 = math.rsqrt %46 : vector<1x96xf32>
    %48 = arith.mulf %37, %47 : vector<1x96xf32>
    %49 = arith.mulf %40, %48 : vector<1x96xf32>
    %50 = arith.subf %38, %49 : vector<1x96xf32>
    %51 = vector.broadcast %48 : vector<1x96xf32> to vector<8x96xf32>
    %52 = arith.mulf %31, %51 : vector<8x96xf32>
    %53 = vector.broadcast %50 : vector<1x96xf32> to vector<8x96xf32>
    %54 = arith.addf %52, %53 : vector<8x96xf32>
    %cst_25 = arith.constant 0.000000e+00 : f32
    %55 = vector.broadcast %cst_25 : f32 to vector<8x96xf32>
    %56 = arith.maximumf %54, %55 : vector<8x96xf32>
    %57 = arith.truncf %56 : vector<8x96xf32> to vector<8x96xbf16>
    %c0_26 = arith.constant 0 : index
    %c0_27 = arith.constant 0 : index
    %58 = vector.load %arg7[%c0_26, %c0_27] : memref<96x4xbf16, #tpu.memory_space<vmem>>, vector<96x4xbf16>
    %cst_28 = arith.constant dense<0.000000e+00> : vector<8x4xf32>
    %59 = tpu.matmul %57, %58, %cst_28 {dimension_numbers = #tpu.dot_dimension_numbers<[1], [0], [0], [1], [0, 0, 1, 1], [], []>} : vector<8x96xbf16>, vector<96x4xbf16>, vector<8x4xf32> -> vector<8x4xf32>
    %c0_29 = arith.constant 0 : index
    %c0_30 = arith.constant 0 : index
    %60 = vector.load %arg8[%c0_29, %c0_30] : memref<1x4xf32, #tpu.memory_space<vmem>>, vector<1x4xf32>
    %61 = vector.broadcast %60 : vector<1x4xf32> to vector<8x4xf32>
    %62 = arith.addf %59, %61 : vector<8x4xf32>
    %cst_31 = arith.constant 5.000000e-01 : f32
    %63 = vector.broadcast %cst_31 : f32 to vector<8x4xf32>
    %64 = arith.mulf %63, %62 : vector<8x4xf32>
    %65 = math.tanh %64 : vector<8x4xf32>
    %cst_32 = arith.constant 1.000000e+00 : f32
    %66 = vector.broadcast %cst_32 : f32 to vector<8x4xf32>
    %67 = arith.addf %65, %66 : vector<8x4xf32>
    %cst_33 = arith.constant 5.000000e-01 : f32
    %68 = vector.broadcast %cst_33 : f32 to vector<8x4xf32>
    %69 = arith.mulf %68, %67 : vector<8x4xf32>
    %70 = math.exp %69 : vector<8x4xf32>
    %cst_34 = arith.constant dense<0.000000e+00> : vector<8xf32>
    %71 = vector.multi_reduction <add>, %70, %cst_34 [1] : vector<8x4xf32> to vector<8xf32>
    %72 = vector.shape_cast %71 : vector<8xf32> to vector<8x1xf32>
    %73 = vector.broadcast %72 : vector<8x1xf32> to vector<8x4xf32>
    %74 = arith.divf %70, %73 : vector<8x4xf32>
    %c0_35 = arith.constant 0 : index
    %c0_36 = arith.constant 0 : index
    %75 = vector.load %arg9[%c0_35, %c0_36] : memref<8x4xf32, #tpu.memory_space<vmem>>, vector<8x4xf32>
    tpu.vector_store %arg9[%c0_35, %c0_36], %74 {strides = array<i32>} : memref<8x4xf32, #tpu.memory_space<vmem>>, vector<8x4xf32>,
    return
  }
}

</mosaic_0001>

<bundles_post_ra>
// kernel: tpu_custom_call.1
= control target key start
LH: loop header
LB: loop body
LE: loop exit
PB: predicated region body
PF: predicated region fallthrough
CT: control target
= control target key end

     0   :  { %14 = vsyncpa [#allocation3], 0  ;;  %s624_s30 = smov [#allocation2]   ;;  %s764_s0 = inlined_call_operand.vmem [shape: f32[8,32], index: 0, kind: input, shape index: {}]   ;;  %s765_s1 = inlined_call_operand.vmem [shape: bf16[32,160], index: 1, kind: input, shape index: {}]   ;;  %s766_s2 = inlined_call_operand.vmem [shape: f32[1,160], index: 2, kind: input, shape index: {}]   ;;  %s767_s3 = inlined_call_operand.vmem [shape: f32[1,160], index: 3, kind: input, shape index: {}]   ;;  %s768_s4 = inlined_call_operand.hbm [shape: bf16[160,96], index: 4, kind: input, shape index: {}]   ;;  %s769_s5 = inlined_call_operand.vmem [shape: f32[1,96], index: 5, kind: input, shape index: {}]   ;;  %s770_s6 = inlined_call_operand.vmem [shape: f32[1,96], index: 6, kind: input, shape index: {}]   ;;  %s771_s7 = inlined_call_operand.vmem [shape: bf16[96,4], index: 7, kind: input, shape index: {}]   ;;  %s772_s8 = inlined_call_operand.vmem [shape: f32[1,4], index: 8, kind: input, shape index: {}]   ;;  %s773_s9 = inlined_call_operand.vmem [shape: f32[8,4], index: 9, kind: output, shape index: {}]  }
   0x1   :  { %s28_s10 = sshll.u32 %s624_s30, 4  ;;  %s600_s13 = scalar_lea.hbm %s768_s4, 1280  ;;  %s29_s10 = int_to_ptr.vmem [resolvable:$true] %s28_s10 }
   0x2   :  { %p601_p0 = scmp.ne.s32.totalorder %s768_s4, %s600_s13  ;;  %p604_p1 = scmp.lt.u32.totalorder %s600_s13, %s768_s4 }
   0x4   :  { %p606_p2 = pnand %p604_p1, %p601_p0 }
   0x6   :  { %609 = shalt.err (!%p606_p2)
}
   0x7   :  { %s610_s18 = scalar_lea.vmem %s29_s10, 1280  ;;  %p615_p4 = scmp.lt.s32.totalorder %s29_s10, %s29_s10 }
   0x8   :  { %p611_p3 = scmp.ne.s32.totalorder %s29_s10, %s610_s18  ;;  %p616_p5 = scmp.lt.s32.totalorder %s610_s18, %s610_s18 }
   0xa   :  { %p617_p6 = por %p616_p5, %p615_p4 }
   0xc   :  { %p618_p7 = pnand %p617_p6, %p611_p3 }
   0xe   :  { %621 = shalt.err (!%p618_p7)
}
   0xf   :  { %s625_s19 = smov 64   ;;  %s626_s20 = smov 4  }
  0x10   :  { %34 = dma.hbm_to_vmem [thread:$0]  %s768_s4, 1280, %s29_s10, [#allocation3], %s625_s19, %s625_s19, %s626_s20  }
  0x11   :  { %622 = dma.done.wait [#allocation3], 1280  }
  0x12   :  { %623 = vsyncadd [#allocation3], 4294966016  ;;  %v627_v0 = vmov 0   ;;  %v566_v1 = vld [vmem:[%s765_s1 + $0x4] ss:$8 sps:$4 sm:$0xff]   ;;  %vm73_vm0 = vcmask 261120   ;;  %v166_v61 = vlaneseq }
  0x13   :  { %109 = vmatprep.mubr.bf16.mxu0 %v627_v0  ;;  %313 = vmatprep.subr.bf16.mxu1 %v627_v0  ;;  %v568_v2 = vld [vmem:[%s765_s1] ss:$8 sps:$4 sm:$0xff]   ;;  %v569_v3 = vld [vmem:[%s765_s1 + $0x14] ss:$8 sps:$4 sm:$0xff]   ;;  %v571_v4 = vld [vmem:[%s765_s1 + $0x10] ss:$8 sps:$4 sm:$0xff]  }
  0x14   :  { %77 = vmatprep.subr.bf16.mxu0 %v566_v1  ;;  %v47_v5 = vld [vmem:[%s764_s0] sm:$0xff]  ;;  %v573_v8 = vld [vmem:[#allocation2 + $0x8] sm:$0xff]   ;;  %v574_v9 = vld [vmem:[#allocation2 + $0x10] sm:$0xff]   ;;  %v628_v59 = vmov 1966171168   ;;  %v167_v63 = vshrl.u32 %v166_v61, 7 }
  0x15   :  { %78 = vmatpush1.bf16.msra.mxu0 %v568_v2  ;;  %v48_v6 = vpack.c.bf16 %v47_v5, %v47_v5  ;;  %v572_v7 = vld [vmem:[#allocation2] sm:$0xff]   ;;  %v575_v10 = vld [vmem:[#allocation2 + $0x18] sm:$0xff]   ;;  %v577_v12 = vld [vmem:[#allocation2 + $0x28] sm:$0xff]   ;;  %v164_v60 = vunpack.c.l.s4 %v628_v59  ;;  %vm630_vm1 = vmmov 0   ;;  %vm353_vm2 = vcmask 785408  }
  0x16   :  { %79 = vmatprep.subr.bf16.mxu0 %v569_v3  ;;  %314 = vmatpush1.bf16.msra.mxu1 %v572_v7  ;;  %v576_v11 = vld [vmem:[#allocation2 + $0x20] sm:$0xff]   ;;  %v578_v13 = vld [vmem:[#allocation2 + $0x30] sm:$0xff]   ;;  %v579_v14 = vld [vmem:[#allocation2 + $0x38] sm:$0xff]   ;;  %v720_v7 = vsub.s32 0, %v167_v63  ;;  %vm500_vm3 = vcmask 31744  }
  0x17   :  { %315 = vmatprep.subr.bf16.mxu1 %v627_v0  ;;  %v580_v15 = vld [vmem:[#allocation2 + $0x40] sm:$0xff]   ;;  %v581_v16 = vld [vmem:[#allocation2 + $0x48] sm:$0xff]   ;;  %v165_v62 = vunpack.c.0.s8 %v164_v60 }
  0x18   :  { %v146_v5 = vld [vmem:[%s766_s2] sm:$0x3] }
  0x19   :  { %80 = vmatpush1.bf16.msra.mxu0 %v571_v4  ;;  %v168_v1 = vsub.s32 %v165_v62, %v167_v63  ;;  %v369_v60 = vld [vmem:[%s769_s5] sm:$0x1] }
  0x1a   :  { %316 = vmatpush1.bf16.msra.mxu1 %v573_v8  ;;  %v186_v8 = vsub.s32 1, %v167_v63  ;;  %v370_v63 = vld [vmem:[%s770_s6] sm:$0x1] }
  0x1b   :  { %317 = vmatprep.subr.bf16.mxu1 %v627_v0 }
  0x1c   :  { %516 = vmatmul.mubr.msk.bf16.vlgmr.msra.gmra.mrb[0].mxu0 %vm73_vm0, %v48_v6 }
  0x1e   :  { %318 = vmatpush1.bf16.msra.mxu1 %v574_v9 }
  0x1f   :  { %319 = vmatprep.subr.bf16.mxu1 %v627_v0 }
  0x22   :  { %320 = vmatpush1.bf16.msra.mxu1 %v575_v10 }
  0x23   :  { %321 = vmatprep.subr.bf16.mxu1 %v627_v0 }
  0x26   :  { %322 = vmatpush1.bf16.msra.mxu1 %v576_v11 }
  0x27   :  { %323 = vmatprep.subr.bf16.mxu1 %v627_v0 }
  0x2a   :  { %324 = vmatpush1.bf16.msra.mxu1 %v577_v12 }
  0x2b   :  { %325 = vmatprep.subr.bf16.mxu1 %v627_v0 }
  0x2e   :  { %326 = vmatpush1.bf16.msra.mxu1 %v578_v13 }
  0x2f   :  { %327 = vmatprep.subr.bf16.mxu1 %v627_v0 }
  0x32   :  { %328 = vmatpush1.bf16.msra.mxu1 %v579_v14 }
  0x33   :  { %329 = vmatprep.subr.bf16.mxu1 %v627_v0 }
  0x36   :  { %330 = vmatpush1.bf16.msra.mxu1 %v580_v15 }
  0x37   :  { %331 = vmatprep.subr.bf16.mxu1 %v627_v0 }
  0x3a   :  { %332 = vmatpush1.bf16.msra.mxu1 %v581_v16 }
  0xef   :  { %v709_v17 = vpop.f32.mrb[0].mxu0 }
  0xf0   :  { %v118_v18 = vrot.slane %v709_v17, 4  ;;  %v131_v19 = vmul.f32 %v709_v17, %v709_v17  ;;  %v113_v20 = vpop.f32.mrb[1].mxu0 }
  0xf1   :  { %v124_v21 = vsel %vm73_vm0, %v113_v20, 0.0  ;;  %v132_v22 = vmul.f32 %v113_v20, %v113_v20  ;;  %v115_v23 = vpop.f32.mrb[2].mxu0 }
  0xf2   :  { %v119_v24 = vadd.f32 %v118_v18, %v709_v17  ;;  %v133_v25 = vrot.slane %v131_v19, 4  ;;  %v125_v26 = vrot.slane %v124_v21, 4  ;;  %v116_v27 = vpop.f32.mrb[3].mxu0 }
  0xf3   :  { %v139_v28 = vsel %vm73_vm0, %v132_v22, 0.0 }
  0xf4   :  { %v120_v29 = vrot.slane %v119_v24, 2  ;;  %v134_v30 = vadd.f32 %v133_v25, %v131_v19  ;;  %v126_v31 = vadd.f32 %v125_v26, %v124_v21  ;;  %v140_v32 = vrot.slane %v139_v28, 4  ;;  %v147_v19 = vld [vmem:[%s767_s3] sm:$0x3] }
  0xf6   :  { %v121_v33 = vadd.f32 %v120_v29, %v119_v24  ;;  %v135_v34 = vrot.slane %v134_v30, 2  ;;  %v127_v35 = vrot.slane %v126_v31, 2  ;;  %v141_v36 = vadd.f32 %v140_v32, %v139_v28  ;;  %v584_v32 = vld [vmem:[%s771_s7 + $0x10] sm:$0xff]  }
  0xf8   :  { %v122_v37 = vrot.slane %v121_v33, 1  ;;  %v136_v38 = vadd.f32 %v135_v34, %v134_v30  ;;  %v128_v39 = vadd.f32 %v127_v35, %v126_v31  ;;  %v142_v40 = vrot.slane %v141_v36, 2  ;;  %v583_v31 = vld [vmem:[%s771_s7 + $0x8] sm:$0xff]   ;;  %v586_v34 = vld [vmem:[%s771_s7 + $0x20] sm:$0xff]  }
  0xf9   :  { %v587_v35 = vld [vmem:[%s771_s7 + $0x28] sm:$0xff]  }
  0xfa   :  { %v123_v41 = vadd.f32 %v122_v37, %v121_v33  ;;  %v137_v42 = vrot.slane %v136_v38, 1  ;;  %v129_v43 = vrot.slane %v128_v39, 1  ;;  %v143_v44 = vadd.f32 %v142_v40, %v141_v36  ;;  %v585_v33 = vld [vmem:[%s771_s7 + $0x18] sm:$0xff]  }
  0xfc   :  { %v138_v45 = vadd.f32 %v137_v42, %v136_v38  ;;  %v148_v46 = vmul.f32 0.125, %v123_v41  ;;  %v130_v47 = vadd.f32 %v129_v43, %v128_v39  ;;  %v144_v48 = vrot.slane %v143_v44, 1 }
  0xfe   :  { %v150_v49 = vmul.f32 0.125, %v138_v45  ;;  %v152_v50 = vmul.f32 %v148_v46, %v148_v46  ;;  %v145_v51 = vadd.f32 %v144_v48, %v143_v44  ;;  %v149_v52 = vmul.f32 0.125, %v130_v47 }
 0x100   :  { %v154_v53 = vsub.f32 %v150_v49, %v152_v50  ;;  %v151_v54 = vmul.f32 0.125, %v145_v51  ;;  %v153_v55 = vmul.f32 %v149_v52, %v149_v52 }
 0x102   :  { %v156_v56 = vadd.f32 1e-05, %v154_v53  ;;  %v155_v57 = vsub.f32 %v151_v54, %v153_v55 }
 0x104   :  { %v157_v58 = vadd.f32 1e-05, %v155_v57  ;;  %588 = vrsqrt.f32 %v156_v56 }
 0x106   :  { %590 = vrsqrt.f32 %v157_v58 }
 0x10e   :  { %v589_v0 = vpop.eup %588 }
 0x110   :  { %v591_v2 = vpop.eup %590 }
 0x111   :  { %v162_v3 = vcombine.low %v589_v0, %v591_v2 }
 0x113   :  { %v169_v4 = vrot.slane %v162_v3, %v168_v1 }
 0x115   :  { %v176_v6 = vrot.slane %v169_v4, %v168_v1 }
 0x117   :  { %v178_v9 = vmul.f32 %v176_v6, %v146_v5 }
 0x119   :  { %v183_v10 = vrot.slane %v178_v9, %v720_v7  ;;  %v187_v11 = vrot.slane %v178_v9, %v186_v8  ;;  %v528_v9 = vld [vmem:[%s772_s8] ss:$0 sm:$0xff] }
 0x11b   :  { %v190_v12 = vmul.f32 %v183_v10, %v148_v46  ;;  %v191_v13 = vmul.f32 %v187_v11, %v149_v52  ;;  %v212_v14 = vmul.f32 %v187_v11, %v113_v20  ;;  %v211_v15 = vmul.f32 %v183_v10, %v709_v17  ;;  %v582_v17 = vld [vmem:[%s771_s7] sm:$0xff]  }
 0x11c   :  { %v629_v20 = vmov 0.0  }
 0x11d   :  { %v194_v16 = vcombine.low %v190_v12, %v191_v13  ;;  %543 = vmatprep.subr.bf16.mxu0 %v629_v20  ;;  %555 = vmatprep.mubr.msk.bf16.mxu0 %vm630_vm1, %v629_v20 }
 0x11e   :  { %544 = vmatpush3.bf16.msra.mxu0 %v582_v17 }
 0x11f   :  { %v201_v18 = vrot.slane %v194_v16, %v168_v1  ;;  %545 = vmatprep.subr.bf16.mxu0 %v629_v20 }
 0x121   :  { %v208_v21 = vrot.slane %v201_v18, %v168_v1 }
 0x122   :  { %546 = vmatpush3.bf16.msra.mxu0 %v583_v31 }
 0x123   :  { %v210_v22 = vsub.f32 %v147_v19, %v208_v21  ;;  %547 = vmatprep.subr.bf16.mxu0 %v629_v20 }
 0x125   :  { %v221_v23 = vrot.slane %v210_v22, %v186_v8  ;;  %v217_v24 = vrot.slane %v210_v22, %v720_v7 }
 0x126   :  { %548 = vmatpush3.bf16.msra.mxu0 %v584_v32 }
 0x127   :  { %v225_v25 = vadd.f32 %v221_v23, %v212_v14  ;;  %v224_v26 = vadd.f32 %v217_v24, %v211_v15  ;;  %549 = vmatprep.subr.bf16.mxu0 %v629_v20 }
 0x129   :  { %v227_v27 = vmax.f32 %v225_v25, 0.0  ;;  %v226_v28 = vmax.f32 %v224_v26, 0.0 }
 0x12a   :  { %550 = vmatpush3.bf16.msra.mxu0 %v585_v33 }
 0x12b   :  { %v229_v29 = vpack.c.bf16 %v227_v27, %v227_v27  ;;  %v228_v30 = vpack.c.bf16 %v226_v28, %v226_v28  ;;  %551 = vmatprep.subr.bf16.mxu0 %v629_v20 }
 0x12d   :  { %527 = vmatprep.mubr.msk.bf16.mxu1 %vm73_vm0, %v229_v29 }
 0x12e   :  { %346 = vmatmul.mubr.bf16.vlgmr.msra.gmra.mrb[0].mxu1 %v228_v30  ;;  %552 = vmatpush3.bf16.msra.mxu0 %v586_v34 }
 0x12f   :  { %553 = vmatprep.subr.bf16.mxu0 %v629_v20 }
 0x132   :  { %554 = vmatpush3.bf16.msra.mxu0 %v587_v35 }
 0x201   :  { %v347_v36 = vpop.f32.mrb[0].mxu1 }
 0x202   :  { %v354_v37 = vsel %vm353_vm2, %v347_v36, 0.0  ;;  %v361_v38 = vmul.f32 %v347_v36, %v347_v36  ;;  %v349_v39 = vpop.f32.mrb[1].mxu1 }
 0x203   :  { %v355_v40 = vrot.slane %v354_v37, 4  ;;  %v350_v41 = vpop.f32.mrb[2].mxu1 }
 0x204   :  { %v362_v42 = vsel %vm353_vm2, %v361_v38, 0.0  ;;  %v351_v43 = vpop.f32.mrb[3].mxu1 }
 0x205   :  { %v356_v44 = vadd.f32 %v355_v40, %v354_v37  ;;  %v363_v45 = vrot.slane %v362_v42, 4 }
 0x207   :  { %v357_v46 = vrot.slane %v356_v44, 2  ;;  %v364_v47 = vadd.f32 %v363_v45, %v362_v42 }
 0x209   :  { %v358_v48 = vadd.f32 %v357_v46, %v356_v44  ;;  %v365_v49 = vrot.slane %v364_v47, 2 }
 0x20b   :  { %v359_v50 = vrot.slane %v358_v48, 1  ;;  %v366_v51 = vadd.f32 %v365_v49, %v364_v47 }
 0x20d   :  { %v360_v52 = vadd.f32 %v359_v50, %v358_v48  ;;  %v367_v53 = vrot.slane %v366_v51, 1 }
 0x20f   :  { %v368_v54 = vadd.f32 %v367_v53, %v366_v51  ;;  %v371_v55 = vmul.f32 0.125, %v360_v52 }
 0x211   :  { %v372_v56 = vmul.f32 0.125, %v368_v54  ;;  %v373_v57 = vmul.f32 %v371_v55, %v371_v55 }
 0x213   :  { %v374_v58 = vsub.f32 %v372_v56, %v373_v57 }
 0x215   :  { %v375_v59 = vadd.f32 1e-05, %v374_v58 }
 0x217   :  { %592 = vrsqrt.f32 %v375_v59 }
 0x221   :  { %v593_v61 = vpop.eup %592 }
 0x222   :  { %v377_v62 = vmul.f32 %v593_v61, %v369_v60 }
 0x224   :  { %v378_v0 = vmul.f32 %v377_v62, %v371_v55  ;;  %v384_v1 = vrot.slane %v377_v62, %v720_v7 }
 0x226   :  { %v379_v2 = vsub.f32 %v370_v63, %v378_v0  ;;  %v386_v3 = vmul.f32 %v384_v1, %v347_v36 }
 0x228   :  { %v391_v4 = vrot.slane %v379_v2, %v720_v7 }
 0x22a   :  { %v393_v5 = vadd.f32 %v391_v4, %v386_v3 }
 0x22c   :  { %v394_v6 = vmax.f32 %v393_v5, 0.0 }
 0x22e   :  { %v395_v8 = vpack.c.bf16 %v394_v6, %v394_v6 }
 0x230   :  { %556 = vmatmul.mubr.msk.bf16.vlgmr.msra.gmra.mrb[4].mxu0 %vm353_vm2, %v395_v8 }
 0x303   :  { %v488_v10 = vpop.f32.mrb[4].mxu0 }
 0x304   :  { %v489_v11 = vadd.f32 %v528_v9, %v488_v10  ;;  %v557_v12 = vpop.f32.mrb[5].mxu0 }
 0x305   :  { %v491_v13 = vpop.f32.mrb[6].mxu0 }
 0x306   :  { %v494_v14 = vmul.f32 0.5, %v489_v11  ;;  %v558_v15 = vpop.f32.mrb[7].mxu0 }
 0x308   :  { %594 = vtanh.f32 %v494_v14 }
 0x312   :  { %v595_v16 = vpop.eup %594 }
 0x313   :  { %v496_v18 = vadd.f32 1.0, %v595_v16 }
 0x315   :  { %v497_v19 = vmul.f32 0.5, %v496_v18 }
 0x317   :  { %v498_v7 = vmul.f32 1.442695, %v497_v19 }
 0x319   :  { %596 = vpow2.f32 %v498_v7 }
 0x323   :  { %v597_v21 = vpop.eup %596 }
 0x324   :  { %v501_v22 = vsel %vm500_vm3, %v597_v21, 0.0 }
 0x325   :  { %502 = vadd.xlane.f32.xlu0 %v501_v22 }
 0x3b2   :  { %v503_v23 = vpop.xlane.xlu0 %502 }
 0x3b3   :  { %598 = vrcp.f32 %v503_v23 }
 0x3bd   :  { %v599_v24 = vpop.eup %598 }
 0x3be   :  { %v505_v25 = vmul.f32 %v599_v24, %v597_v21 }
 0x3c0   :  { %506 = vst.msk [vmem:[%s773_s9] sm:$0xff] %vm500_vm3, %v505_v25 }
 0x3c1   :  { %511 = vsyncpa [#allocation3], 1 }

</bundles_post_ra>
